<compile_context>
chip_gen: v7x
topology: tpu7x:2x2x1
jax: 0.10.0
libtpu: 0.0.40
codegen_flags: <defaults>
</compile_context>

<pallas_src>
from functools import partial

import jax
import jax.numpy as jnp
import numpy as np
from jax import lax
from jax.experimental import pallas as pl
from jax.experimental.pallas import tpu as pltpu


def _round_up(a, b):
    return (a + b - 1) // b * b


def _fused_conv_add_relu_kernel(p_ref, w_ref, b_ref, o_ref):
    # relu(conv2d(x) + conv1d(x)) expressed as a single GEMM + bias + relu:
    #   p = [p1 | p2]  (concat along K),  w = [w1m ; w2m]  (stacked along K),
    #   b = b1 + b2  (pre-summed on host), zero-padded K/N columns contribute 0.
    y = jnp.dot(p_ref[...], w_ref[...], preferred_element_type=jnp.float32)
    o_ref[...] = jnp.maximum(y + b_ref[...], 0.0)


def _im2col(x, kh, kw, sh, sw, ph, pw):
    """x: (N,C,H,W) -> patches (N*Ho*Wo, C*kh*kw) with (C, kh, kw) flattening order."""
    n, c, h, w = x.shape
    ho = (h + 2 * ph - kh) // sh + 1
    wo = (w + 2 * pw - kw) // sw + 1
    xp = jnp.pad(x, ((0, 0), (0, 0), (ph, ph), (pw, pw)))
    cols = []
    for i in range(kh):
        for j in range(kw):
            cols.append(xp[:, :, i:i + sh * ho:sh, j:j + sw * wo:sw])  # (n,c,ho,wo)
    p = jnp.stack(cols, axis=0).reshape(kh, kw, n, c, ho, wo)
    p = p.transpose(2, 4, 5, 3, 0, 1).reshape(n * ho * wo, c * kh * kw)
    return p, ho, wo


def init_params(key):
    """Deterministic Conv2d(3,4,(3,5)) and Conv1d(3,4,5) params (PyTorch-style uniform init)."""
    k1, k2, k3, k4 = jax.random.split(key, 4)
    lim1 = 1.0 / np.sqrt(3 * 3 * 5)
    lim2 = 1.0 / np.sqrt(3 * 5)
    w1 = jax.random.uniform(k1, (4, 3, 3, 5), jnp.float32, -lim1, lim1)
    b1 = jax.random.uniform(k2, (4,), jnp.float32, -lim1, lim1)
    w2 = jax.random.uniform(k3, (4, 3, 5), jnp.float32, -lim2, lim2)
    b2 = jax.random.uniform(k4, (4,), jnp.float32, -lim2, lim2)
    return w1, b1, w2, b2


def prepare_params(params):
    """One-time, data-independent packing of both conv weights into a single fused GEMM weight.

    Returns (wk, bk, cout):
      wk: (128, 128) f32  = [w1 reshaped (45,4) ; w2 reshaped (15,4)] zero-padded
      bk: (1, 128)   f32  = (b1 + b2) zero-padded
    """
    w1, b1, w2, b2 = params
    cout = int(w1.shape[0])
    k1 = int(np.prod(w1.shape[1:]))   # 3*3*5 = 45
    k2 = int(np.prod(w2.shape[1:]))   # 3*5   = 15
    k = k1 + k2                       # 60
    kp = _round_up(k, 128)
    cp = _round_up(cout, 128)
    w_comb = jnp.concatenate([w1.reshape(cout, k1).T, w2.reshape(cout, k2).T], axis=0)  # (60, 4)
    wk = jnp.pad(w_comb, ((0, kp - k), (0, cp - cout)))                                  # (128, 128)
    bk = jnp.pad((b1 + b2)[None, :], ((0, 0), (0, cp - cout)))                           # (1, 128)
    return wk, bk, cout


@partial(jax.jit, static_argnames=("cout",))
def model_forward(x, wk, bk, *, cout):
    n, c, h, w = x.shape

    # conv1: Conv2d(3, 4, (3, 5), stride=(2, 3), padding=(1, 2)) via im2col.
    p1, ho, wo = _im2col(x, 3, 5, 2, 3, 1, 2)
    # conv2: Conv1d(3, 4, 5, stride=3, padding=2), applied row-wise along W.
    # TODO(synk): PyTorch's Conv1d rejects the 4-D x1 in the original forward (the source
    # model crashes at runtime); we define it as a per-row 1-D conv along W, and the
    # v1 + v2 add is then only well-formed when conv2d's H_out == H (i.e. H == 1).
    p2, h2, lo = _im2col(x, 1, 5, 1, 3, 0, 2)
    assert ho == h2 and wo == lo, "v1 + v2 add requires matching output spatial shapes"

    m = n * ho * wo
    mp = _round_up(m, 8)
    kp, cp = wk.shape

    # Single patch matrix for the fused GEMM: concat both branches along K, one pad.
    p = jnp.concatenate([p1, p2], axis=1)                         # (m, 60)
    pp = jnp.pad(p, ((0, mp - m), (0, kp - p.shape[1])))          # (mp, 128)

    out = pl.pallas_call(
        _fused_conv_add_relu_kernel,
        out_shape=jax.ShapeDtypeStruct((mp, cp), jnp.float32),
        in_specs=[
            pl.BlockSpec(memory_space=pltpu.MemorySpace.VMEM),
            pl.BlockSpec(memory_space=pltpu.MemorySpace.VMEM),
            pl.BlockSpec(memory_space=pltpu.MemorySpace.VMEM),
        ],
        out_specs=pl.BlockSpec(memory_space=pltpu.MemorySpace.VMEM),
    )(pp, wk, bk)

    y = out[:m, :cout].reshape(n, ho, wo, cout).transpose(0, 3, 1, 2)  # back to NCHW
    return y


def reference_forward(x, params):
    w1, b1, w2, b2 = params
    v1 = lax.conv_general_dilated(x, w1, (2, 3), ((1, 1), (2, 2)),
                                  dimension_numbers=("NCHW", "OIHW", "NCHW"))
    v1 = v1 + b1[None, :, None, None]
    v2 = lax.conv_general_dilated(x, w2[:, :, None, :], (1, 3), ((0, 0), (2, 2)),
                                  dimension_numbers=("NCHW", "OIHW", "NCHW"))
    v2 = v2 + b2[None, :, None, None]
    return jnp.maximum(v1 + v2, 0.0)


if __name__ == "__main__":
    key = jax.random.PRNGKey(0)
    kparam, kx = jax.random.split(key)
    params = init_params(kparam)
    wk, bk, cout = prepare_params(params)

    # H = 1 so both branches produce (N, 4, 1, 6) and the add is well-formed
    # (conv2d: H_out = (1+2-3)//2+1 = 1, W_out = (16+4-5)//3+1 = 6; row-wise conv1d: 6).
    x = jax.random.normal(kx, (2, 3, 1, 16), jnp.float32)

    y = model_forward(x, wk, bk, cout=cout)
    y = jax.block_until_ready(y)

    y_ref = reference_forward(x, params)
    assert y.shape == y_ref.shape == (2, 4, 1, 6)
    np.testing.assert_allclose(np.asarray(y), np.asarray(y_ref), rtol=1e-2, atol=1e-2)
    print("KERNEL_OK")
</pallas_src>

<mosaic_0001>
module attributes {stable_mosaic.version = 11 : i64} {
  func.func @_fused_conv_add_relu_kernel(%arg0: memref<16x128xf32, #tpu.memory_space<vmem>>, %arg1: memref<128x128xf32, #tpu.memory_space<vmem>>, %arg2: memref<1x128xf32, #tpu.memory_space<vmem>>, %arg3: memref<16x128xf32, #tpu.memory_space<vmem>>) attributes {dimension_semantics = [], scalar_prefetch = 0 : i64, scratch_operands = 0 : i64, tpu.core_type = #tpu.core_type<tc>} {
    %c0 = arith.constant 0 : index
    %c0_0 = arith.constant 0 : index
    %0 = vector.load %arg0[%c0, %c0_0] : memref<16x128xf32, #tpu.memory_space<vmem>>, vector<16x128xf32>
    %c0_1 = arith.constant 0 : index
    %c0_2 = arith.constant 0 : index
    %1 = vector.load %arg1[%c0_1, %c0_2] : memref<128x128xf32, #tpu.memory_space<vmem>>, vector<128x128xf32>
    %cst = arith.constant dense<0.000000e+00> : vector<16x128xf32>
    %2 = tpu.matmul %0, %1, %cst {dimension_numbers = #tpu.dot_dimension_numbers<[1], [0], [0], [1], [0, 0, 1, 1], [], []>} : vector<16x128xf32>, vector<128x128xf32>, vector<16x128xf32> -> vector<16x128xf32>
    %c0_3 = arith.constant 0 : index
    %c0_4 = arith.constant 0 : index
    %3 = vector.load %arg2[%c0_3, %c0_4] : memref<1x128xf32, #tpu.memory_space<vmem>>, vector<1x128xf32>
    %4 = vector.broadcast %3 : vector<1x128xf32> to vector<16x128xf32>
    %5 = arith.addf %2, %4 : vector<16x128xf32>
    %cst_5 = arith.constant 0.000000e+00 : f32
    %6 = vector.broadcast %cst_5 : f32 to vector<16x128xf32>
    %7 = arith.maximumf %5, %6 : vector<16x128xf32>
    %c0_6 = arith.constant 0 : index
    %c0_7 = arith.constant 0 : index
    %8 = vector.load %arg3[%c0_6, %c0_7] : memref<16x128xf32, #tpu.memory_space<vmem>>, vector<16x128xf32>
    tpu.vector_store %arg3[%c0_6, %c0_7], %7 {strides = array<i32>} : memref<16x128xf32, #tpu.memory_space<vmem>>, vector<16x128xf32>,
    return
  }
}

</mosaic_0001>

<bundles_post_ra>
// kernel: model_forward.1
= control target key start
LH: loop header
LB: loop body
LE: loop exit
PB: predicated region body
PF: predicated region fallthrough
CT: control target
= control target key end

     0   :  { %s291_s1 = inlined_call_operand.vmem [shape: f32[128,128], index: 1, kind: input, shape index: {}]   ;;  %s292_s0 = inlined_call_operand.vmem [shape: f32[16,128], index: 0, kind: input, shape index: {}]   ;;  %s293_s2 = inlined_call_operand.vmem [shape: f32[1,128], index: 2, kind: input, shape index: {}]   ;;  %s294_s3 = inlined_call_operand.vmem [shape: f32[16,128], index: 3, kind: output, shape index: {}]  }
   0x1   :  { %v16_v0 = vld [vmem:[%s291_s1] sm:$0xff]  ;;  %v17_v1 = vld [vmem:[%s291_s1 + $0x8] sm:$0xff]  ;;  %v18_v2 = vld [vmem:[%s291_s1 + $0x10] sm:$0xff] }
   0x2   :  { %v176_v3 = vpack.c.bf16 %v17_v1, %v16_v0  ;;  %v19_v4 = vld [vmem:[%s291_s1 + $0x18] sm:$0xff]  ;;  %v20_v6 = vld [vmem:[%s291_s1 + $0x20] sm:$0xff]  ;;  %v21_v7 = vld [vmem:[%s291_s1 + $0x28] sm:$0xff] }
   0x3   :  { %v180_v5 = vpack.c.bf16 %v19_v4, %v18_v2  ;;  %v184_v8 = vpack.c.bf16 %v21_v7, %v20_v6  ;;  %v14_v9 = vld [vmem:[%s292_s0] sm:$0xff]  ;;  %v22_v10 = vld [vmem:[%s291_s1 + $0x30] sm:$0xff]  ;;  %v23_v11 = vld [vmem:[%s291_s1 + $0x38] sm:$0xff] }
   0x4   :  { %177 = vmatprep.subr.bf16.mxu0 %v176_v3  ;;  %173 = vmatprep.mubr.f32.mxu0 %v14_v9  ;;  %v188_v12 = vpack.c.bf16 %v23_v11, %v22_v10  ;;  %v24_v13 = vld [vmem:[%s291_s1 + $0x40] sm:$0xff]  ;;  %v25_v14 = vld [vmem:[%s291_s1 + $0x48] sm:$0xff]  ;;  %v26_v16 = vld [vmem:[%s291_s1 + $0x50] sm:$0xff] }
   0x5   :  { %179 = vmatpush3.bf16.msra.mxu0 %v176_v3  ;;  %v192_v15 = vpack.c.bf16 %v25_v14, %v24_v13  ;;  %v27_v17 = vld [vmem:[%s291_s1 + $0x58] sm:$0xff]  ;;  %v28_v19 = vld [vmem:[%s291_s1 + $0x60] sm:$0xff]  ;;  %v29_v20 = vld [vmem:[%s291_s1 + $0x68] sm:$0xff] }
   0x6   :  { %181 = vmatprep.subr.bf16.mxu0 %v180_v5  ;;  %v196_v18 = vpack.c.bf16 %v27_v17, %v26_v16  ;;  %v200_v21 = vpack.c.bf16 %v29_v20, %v28_v19  ;;  %v30_v22 = vld [vmem:[%s291_s1 + $0x70] sm:$0xff]  ;;  %v31_v23 = vld [vmem:[%s291_s1 + $0x78] sm:$0xff]  ;;  %v15_v25 = vld [vmem:[%s292_s0 + $0x8] sm:$0xff] }
   0x7   :  { %v204_v24 = vpack.c.bf16 %v31_v23, %v30_v22  ;;  %v122_v26 = vld [vmem:[%s293_s2] ss:$0 sm:$0xff] }
   0x9   :  { %183 = vmatpush3.bf16.msra.mxu0 %v180_v5 }
   0xa   :  { %185 = vmatprep.subr.bf16.mxu0 %v184_v8 }
   0xd   :  { %187 = vmatpush3.bf16.msra.mxu0 %v184_v8 }
   0xe   :  { %189 = vmatprep.subr.bf16.mxu0 %v188_v12 }
  0x11   :  { %191 = vmatpush3.bf16.msra.mxu0 %v188_v12 }
  0x12   :  { %193 = vmatprep.subr.bf16.mxu0 %v192_v15 }
  0x15   :  { %195 = vmatpush3.bf16.msra.mxu0 %v192_v15 }
  0x16   :  { %197 = vmatprep.subr.bf16.mxu0 %v196_v18 }
  0x19   :  { %199 = vmatpush3.bf16.msra.mxu0 %v196_v18 }
  0x1a   :  { %201 = vmatprep.subr.bf16.mxu0 %v200_v21 }
  0x1d   :  { %203 = vmatpush3.bf16.msra.mxu0 %v200_v21 }
  0x1e   :  { %205 = vmatprep.subr.bf16.mxu0 %v204_v24 }
  0x21   :  { %207 = vmatpush3.bf16.msra.mxu0 %v204_v24 }
  0x24   :  { %174 = vmatmul.mubr.f32.vlgmr.msra.gmra.mrb[0].mxu0 %v15_v25 }
  0xf7   :  { %v175_v27 = vpop.f32.mrb[0].mxu0 }
  0xf8   :  { %v111_v28 = vadd.f32 %v175_v27, %v122_v26  ;;  %v105_v29 = vpop.f32.mrb[1].mxu0 }
  0xf9   :  { %v106_v30 = vadd.f32 %v122_v26, %v105_v29 }
  0xfa   :  { %v115_v31 = vmax.f32 %v111_v28, 0.0 }
  0xfb   :  { %v114_v32 = vmax.f32 %v106_v30, 0.0 }
  0xfc   :  { %117 = vst [vmem:[%s294_s3 + $0x8] sm:$0xff] %v115_v31 }
  0xfd   :  { %116 = vst [vmem:[%s294_s3] sm:$0xff] %v114_v32 }

</bundles_post_ra>
